<compile_context>
chip_gen: v5e
topology: v5e:2x2
jax: 0.10.0
libtpu: 0.0.40
codegen_flags: <defaults>
</compile_context>

<pallas_src>
import jax
import jax.numpy as jnp
from jax.experimental import pallas as pl
from jax.experimental.pallas import tpu as pltpu

INPUT_DIM = 6
N_CLASSES = 7
OUT_PAD = 128            # lane-dense padded logit width
BN_EPS = 1e-5
MAX_TILE_N = 4096        # large tiles amortize per-grid-step overhead
MIN_SPLIT_N = 1024       # batches >= this always get >= 2 grid steps (v7x dual-TC)


def _mlp_kernel(x_ref,
                w1_ref, b1_ref,
                w2_ref, b2_ref,
                w3_ref, b3_ref,
                w4_ref, b4_ref,
                w5_ref, b5_ref,
                o_ref):
    """Fused MLP forward on one (TILE_N, INPUT_DIM) batch tile.

    BatchNorm (eval) is pre-folded into the weights; Dropout is identity.
    Layer 1 in f32 (tiny K); layers 2-5 bf16 on the MXU with f32 accumulation.
    """
    # Layer 1: 6 -> 128 in full f32 (preserves input dynamic range; nearly free).
    h = jnp.dot(x_ref[...], w1_ref[...], preferred_element_type=jnp.float32)
    h = jnp.maximum(h + b1_ref[...], 0.0).astype(jnp.bfloat16)

    def block(h_bf16, w_ref, b_ref):
        y = jnp.dot(h_bf16, w_ref[...], preferred_element_type=jnp.float32)
        return jnp.maximum(y + b_ref[...], 0.0).astype(jnp.bfloat16)

    h = block(h, w2_ref, b2_ref)    # 128 -> 256
    h = block(h, w3_ref, b3_ref)    # 256 -> 128
    h = block(h, w4_ref, b4_ref)    # 128 -> 64

    logits = jnp.dot(h, w5_ref[...], preferred_element_type=jnp.float32)
    o_ref[...] = (logits + b5_ref[...]).astype(o_ref.dtype)   # bf16, lane-dense


def _xavier_uniform(key, fan_in, fan_out):
    # Matches nn.init.xavier_uniform_ for a (fan_out, fan_in) weight; built
    # directly in the transposed (fan_in, fan_out) layout used by the kernel.
    limit = jnp.sqrt(6.0 / (fan_in + fan_out))
    return jax.random.uniform(key, (fan_in, fan_out), jnp.float32, -limit, limit)


def _fold_bn(w, b, gamma, beta, running_mean, running_var, eps=BN_EPS):
    """Fold eval-mode BatchNorm1d into the preceding linear layer.

    w: (in, out) f32, b: (out,) f32; BN params are (out,) f32.
    Real checkpoints should pass their actual running stats here.
    """
    scale = gamma / jnp.sqrt(running_var + eps)
    return w * scale[None, :], b * scale + (beta - running_mean * scale)


def init_params(key):
    """[(w_i, b_i)] with BN folded in.

    w1 stays f32 (tiny, and keeps raw features at full precision); w2..w5 are
    bf16. Biases are f32 shaped (1, out). The classifier is zero-padded from
    N_CLASSES to OUT_PAD columns for a lane-dense output store.
    """
    dims = [INPUT_DIM, 128, 256, 128, 64, N_CLASSES]
    keys = jax.random.split(key, 5)
    params = []
    for i in range(5):
        fan_in, fan_out = dims[i], dims[i + 1]
        w = _xavier_uniform(keys[i], fan_in, fan_out)
        b = jnp.zeros((fan_out,), jnp.float32)
        if i < 4:
            # Freshly-initialized eval-mode BN stats (mean=0, var=1, gamma=1, beta=0).
            w, b = _fold_bn(
                w, b,
                gamma=jnp.ones((fan_out,), jnp.float32),
                beta=jnp.zeros((fan_out,), jnp.float32),
                running_mean=jnp.zeros((fan_out,), jnp.float32),
                running_var=jnp.ones((fan_out,), jnp.float32),
            )
            w_store = w.astype(jnp.float32) if i == 0 else w.astype(jnp.bfloat16)
        else:
            # Lane-dense padded classifier (7 -> 128 output columns).
            w = jnp.pad(w, ((0, 0), (0, OUT_PAD - fan_out)))
            b = jnp.pad(b, (0, OUT_PAD - fan_out))
            w_store = w.astype(jnp.bfloat16)
        params.append((w_store, b.reshape(1, -1)))
    return params


def _round_up(x, m):
    return (x + m - 1) // m * m


def _choose_tile(n):
    """Pick (tile_n, n_pad): tile_n is a multiple of 16 and divides n_pad.

    Goals: big tiles (amortize ~0.35 us/step grid overhead), >= 2 grid steps
    for batches >= MIN_SPLIT_N (v7x dual-TC), and bounded padding waste.
    """
    n16 = _round_up(max(n, 1), 16)
    if n16 < MIN_SPLIT_N:
        return n16, n16                                   # single small step
    if n16 <= 2 * MAX_TILE_N:
        tile = _round_up(-(-n16 // 2), 16)                # exactly 2 steps
        return tile, _round_up(n16, tile)
    # Very large batch: largest ladder tile with <= ~12.5% padding waste.
    for tile in (MAX_TILE_N, 2048, 1024, 512):
        n_pad = _round_up(n16, tile)
        if (n_pad - n16) <= n16 // 8 or tile == 512:
            return tile, n_pad
    return 512, _round_up(n16, 512)                       # unreachable fallback


@jax.jit
def network_anomaly_classifier(x, params):
    (w1, b1), (w2, b2), (w3, b3), (w4, b4), (w5, b5) = params
    n = x.shape[0]
    tile_n, n_pad = _choose_tile(n)
    x_p = jnp.pad(x.astype(jnp.float32), ((0, n_pad - n), (0, 0)))

    full = lambda i: (0, 0)                               # resident weight blocks

    flops = 2 * n_pad * (INPUT_DIM * 128 + 128 * 256 + 256 * 128
                         + 128 * 64 + 64 * OUT_PAD)
    weight_bytes = sum(int(w.size) * w.dtype.itemsize + int(b.size) * 4
                       for (w, b) in params)
    bytes_accessed = n_pad * (INPUT_DIM * 4 + OUT_PAD * 2) + weight_bytes

    out = pl.pallas_call(
        _mlp_kernel,
        out_shape=jax.ShapeDtypeStruct((n_pad, OUT_PAD), jnp.bfloat16),
        grid=(n_pad // tile_n,),
        in_specs=[
            pl.BlockSpec((tile_n, INPUT_DIM), lambda i: (i, 0)),
            pl.BlockSpec(w1.shape, full), pl.BlockSpec(b1.shape, full),
            pl.BlockSpec(w2.shape, full), pl.BlockSpec(b2.shape, full),
            pl.BlockSpec(w3.shape, full), pl.BlockSpec(b3.shape, full),
            pl.BlockSpec(w4.shape, full), pl.BlockSpec(b4.shape, full),
            pl.BlockSpec(w5.shape, full), pl.BlockSpec(b5.shape, full),
        ],
        out_specs=pl.BlockSpec((tile_n, OUT_PAD), lambda i: (i, 0)),
        compiler_params=pltpu.CompilerParams(
            dimension_semantics=("parallel",),
            vmem_limit_bytes=64 * 1024 * 1024,
        ),
        cost_estimate=pl.CostEstimate(
            flops=flops, transcendentals=0, bytes_accessed=bytes_accessed),
    )(x_p, w1, b1, w2, b2, w3, b3, w4, b4, w5, b5)

    return out[:n, :N_CLASSES].astype(jnp.float32)


def _reference(x, params):
    # Pure-JAX f32 reference using the same (BN-folded) parameters.
    (w1, b1), (w2, b2), (w3, b3), (w4, b4), (w5, b5) = params
    h = x.astype(jnp.float32)
    for w, b in [(w1, b1), (w2, b2), (w3, b3), (w4, b4)]:
        h = jnp.maximum(h @ w.astype(jnp.float32) + b, 0.0)
    logits = h @ w5.astype(jnp.float32) + b5
    return logits[:, :N_CLASSES]


if __name__ == "__main__":
    key = jax.random.PRNGKey(0)
    k_x, k_p = jax.random.split(key)

    batch = 8
    x = jax.random.normal(k_x, (batch, INPUT_DIM), jnp.float32)
    params = init_params(k_p)

    out = jax.block_until_ready(network_anomaly_classifier(x, params))

    ref = _reference(x, params)
    assert out.shape == (batch, N_CLASSES)
    # bf16 matmuls (f32 accumulation) + bf16 logit store vs f32 reference.
    assert jnp.allclose(out, ref, atol=5e-2, rtol=5e-2), \
        float(jnp.max(jnp.abs(out - ref)))

    # TODO(synk): training-mode BatchNorm (batch statistics) and Dropout masks
    # are not implemented; this kernel is the eval-mode forward pass only.
    print("KERNEL_OK")
</pallas_src>

<mosaic_0001>
module attributes {stable_mosaic.version = 11 : i64} {
  func.func @_mlp_kernel(%arg0: i32, %arg1: memref<16x6xf32, #tpu.memory_space<vmem>>, %arg2: memref<6x128xf32, #tpu.memory_space<vmem>>, %arg3: memref<1x128xf32, #tpu.memory_space<vmem>>, %arg4: memref<128x256xbf16, #tpu.memory_space<vmem>>, %arg5: memref<1x256xf32, #tpu.memory_space<vmem>>, %arg6: memref<256x128xbf16, #tpu.memory_space<vmem>>, %arg7: memref<1x128xf32, #tpu.memory_space<vmem>>, %arg8: memref<128x64xbf16, #tpu.memory_space<vmem>>, %arg9: memref<1x64xf32, #tpu.memory_space<vmem>>, %arg10: memref<64x128xbf16, #tpu.memory_space<vmem>>, %arg11: memref<1x128xf32, #tpu.memory_space<vmem>>, %arg12: memref<16x128xbf16, #tpu.memory_space<vmem>>) attributes {dimension_semantics = [#tpu.dimension_semantics<parallel>], iteration_bounds = array<i64: 1>, scalar_prefetch = 0 : i64, scratch_operands = 0 : i64, tpu.core_type = #tpu.core_type<tc>, window_params = [{transform_indices = @transform_0, window_bounds = array<i64: 16, 6>}, {pipeline_mode = #tpu.pipeline_mode<synchronous>, transform_indices = @transform_1, window_bounds = array<i64: 6, 128>}, {pipeline_mode = #tpu.pipeline_mode<synchronous>, transform_indices = @transform_2, window_bounds = array<i64: 1, 128>}, {pipeline_mode = #tpu.pipeline_mode<synchronous>, transform_indices = @transform_3, window_bounds = array<i64: 128, 256>}, {pipeline_mode = #tpu.pipeline_mode<synchronous>, transform_indices = @transform_4, window_bounds = array<i64: 1, 256>}, {pipeline_mode = #tpu.pipeline_mode<synchronous>, transform_indices = @transform_5, window_bounds = array<i64: 256, 128>}, {pipeline_mode = #tpu.pipeline_mode<synchronous>, transform_indices = @transform_6, window_bounds = array<i64: 1, 128>}, {pipeline_mode = #tpu.pipeline_mode<synchronous>, transform_indices = @transform_7, window_bounds = array<i64: 128, 64>}, {pipeline_mode = #tpu.pipeline_mode<synchronous>, transform_indices = @transform_8, window_bounds = array<i64: 1, 64>}, {pipeline_mode = #tpu.pipeline_mode<synchronous>, transform_indices = @transform_9, window_bounds = array<i64: 64, 128>}, {pipeline_mode = #tpu.pipeline_mode<synchronous>, transform_indices = @transform_10, window_bounds = array<i64: 1, 128>}, {transform_indices = @transform_11, window_bounds = array<i64: 16, 128>}]} {
    %c0 = arith.constant 0 : index
    %c0_0 = arith.constant 0 : index
    %0 = vector.load %arg1[%c0, %c0_0] : memref<16x6xf32, #tpu.memory_space<vmem>>, vector<16x6xf32>
    %c0_1 = arith.constant 0 : index
    %c0_2 = arith.constant 0 : index
    %1 = vector.load %arg2[%c0_1, %c0_2] : memref<6x128xf32, #tpu.memory_space<vmem>>, vector<6x128xf32>
    %cst = arith.constant dense<0.000000e+00> : vector<16x128xf32>
    %2 = tpu.matmul %0, %1, %cst {dimension_numbers = #tpu.dot_dimension_numbers<[1], [0], [0], [1], [0, 0, 1, 1], [], []>} : vector<16x6xf32>, vector<6x128xf32>, vector<16x128xf32> -> vector<16x128xf32>
    %c0_3 = arith.constant 0 : index
    %c0_4 = arith.constant 0 : index
    %3 = vector.load %arg3[%c0_3, %c0_4] : memref<1x128xf32, #tpu.memory_space<vmem>>, vector<1x128xf32>
    %4 = vector.broadcast %3 : vector<1x128xf32> to vector<16x128xf32>
    %5 = arith.addf %2, %4 : vector<16x128xf32>
    %cst_5 = arith.constant 0.000000e+00 : f32
    %6 = vector.broadcast %cst_5 : f32 to vector<16x128xf32>
    %7 = arith.maximumf %5, %6 : vector<16x128xf32>
    %8 = arith.truncf %7 : vector<16x128xf32> to vector<16x128xbf16>
    %c0_6 = arith.constant 0 : index
    %c0_7 = arith.constant 0 : index
    %9 = vector.load %arg4[%c0_6, %c0_7] : memref<128x256xbf16, #tpu.memory_space<vmem>>, vector<128x256xbf16>
    %cst_8 = arith.constant dense<0.000000e+00> : vector<16x256xf32>
    %10 = tpu.matmul %8, %9, %cst_8 {dimension_numbers = #tpu.dot_dimension_numbers<[1], [0], [0], [1], [0, 0, 1, 1], [], []>} : vector<16x128xbf16>, vector<128x256xbf16>, vector<16x256xf32> -> vector<16x256xf32>
    %c0_9 = arith.constant 0 : index
    %c0_10 = arith.constant 0 : index
    %11 = vector.load %arg5[%c0_9, %c0_10] : memref<1x256xf32, #tpu.memory_space<vmem>>, vector<1x256xf32>
    %12 = vector.broadcast %11 : vector<1x256xf32> to vector<16x256xf32>
    %13 = arith.addf %10, %12 : vector<16x256xf32>
    %cst_11 = arith.constant 0.000000e+00 : f32
    %14 = vector.broadcast %cst_11 : f32 to vector<16x256xf32>
    %15 = arith.maximumf %13, %14 : vector<16x256xf32>
    %16 = arith.truncf %15 : vector<16x256xf32> to vector<16x256xbf16>
    %c0_12 = arith.constant 0 : index
    %c0_13 = arith.constant 0 : index
    %17 = vector.load %arg6[%c0_12, %c0_13] : memref<256x128xbf16, #tpu.memory_space<vmem>>, vector<256x128xbf16>
    %cst_14 = arith.constant dense<0.000000e+00> : vector<16x128xf32>
    %18 = tpu.matmul %16, %17, %cst_14 {dimension_numbers = #tpu.dot_dimension_numbers<[1], [0], [0], [1], [0, 0, 1, 1], [], []>} : vector<16x256xbf16>, vector<256x128xbf16>, vector<16x128xf32> -> vector<16x128xf32>
    %c0_15 = arith.constant 0 : index
    %c0_16 = arith.constant 0 : index
    %19 = vector.load %arg7[%c0_15, %c0_16] : memref<1x128xf32, #tpu.memory_space<vmem>>, vector<1x128xf32>
    %20 = vector.broadcast %19 : vector<1x128xf32> to vector<16x128xf32>
    %21 = arith.addf %18, %20 : vector<16x128xf32>
    %cst_17 = arith.constant 0.000000e+00 : f32
    %22 = vector.broadcast %cst_17 : f32 to vector<16x128xf32>
    %23 = arith.maximumf %21, %22 : vector<16x128xf32>
    %24 = arith.truncf %23 : vector<16x128xf32> to vector<16x128xbf16>
    %c0_18 = arith.constant 0 : index
    %c0_19 = arith.constant 0 : index
    %25 = vector.load %arg8[%c0_18, %c0_19] : memref<128x64xbf16, #tpu.memory_space<vmem>>, vector<128x64xbf16>
    %cst_20 = arith.constant dense<0.000000e+00> : vector<16x64xf32>
    %26 = tpu.matmul %24, %25, %cst_20 {dimension_numbers = #tpu.dot_dimension_numbers<[1], [0], [0], [1], [0, 0, 1, 1], [], []>} : vector<16x128xbf16>, vector<128x64xbf16>, vector<16x64xf32> -> vector<16x64xf32>
    %c0_21 = arith.constant 0 : index
    %c0_22 = arith.constant 0 : index
    %27 = vector.load %arg9[%c0_21, %c0_22] : memref<1x64xf32, #tpu.memory_space<vmem>>, vector<1x64xf32>
    %28 = vector.broadcast %27 : vector<1x64xf32> to vector<16x64xf32>
    %29 = arith.addf %26, %28 : vector<16x64xf32>
    %cst_23 = arith.constant 0.000000e+00 : f32
    %30 = vector.broadcast %cst_23 : f32 to vector<16x64xf32>
    %31 = arith.maximumf %29, %30 : vector<16x64xf32>
    %32 = arith.truncf %31 : vector<16x64xf32> to vector<16x64xbf16>
    %c0_24 = arith.constant 0 : index
    %c0_25 = arith.constant 0 : index
    %33 = vector.load %arg10[%c0_24, %c0_25] : memref<64x128xbf16, #tpu.memory_space<vmem>>, vector<64x128xbf16>
    %cst_26 = arith.constant dense<0.000000e+00> : vector<16x128xf32>
    %34 = tpu.matmul %32, %33, %cst_26 {dimension_numbers = #tpu.dot_dimension_numbers<[1], [0], [0], [1], [0, 0, 1, 1], [], []>} : vector<16x64xbf16>, vector<64x128xbf16>, vector<16x128xf32> -> vector<16x128xf32>
    %c0_27 = arith.constant 0 : index
    %c0_28 = arith.constant 0 : index
    %35 = vector.load %arg11[%c0_27, %c0_28] : memref<1x128xf32, #tpu.memory_space<vmem>>, vector<1x128xf32>
    %36 = vector.broadcast %35 : vector<1x128xf32> to vector<16x128xf32>
    %37 = arith.addf %34, %36 : vector<16x128xf32>
    %38 = arith.truncf %37 : vector<16x128xf32> to vector<16x128xbf16>
    %c0_29 = arith.constant 0 : index
    %c0_30 = arith.constant 0 : index
    %39 = vector.load %arg12[%c0_29, %c0_30] : memref<16x128xbf16, #tpu.memory_space<vmem>>, vector<16x128xbf16>
    tpu.vector_store %arg12[%c0_29, %c0_30], %38 {strides = array<i32>} : memref<16x128xbf16, #tpu.memory_space<vmem>>, vector<16x128xbf16>,
    return
  }
  func.func @transform_0(%arg0: i32) -> (i32, i32) {
    %c0_i32 = arith.constant 0 : i32
    %c0_i32_0 = arith.constant 0 : i32
    return %arg0, %c0_i32 : i32, i32
  }
  func.func @transform_1(%arg0: i32) -> (i32, i32) {
    %c0_i32 = arith.constant 0 : i32
    %c0_i32_0 = arith.constant 0 : i32
    %c0_i32_1 = arith.constant 0 : i32
    return %c0_i32, %c0_i32_0 : i32, i32
  }
  func.func @transform_2(%arg0: i32) -> (i32, i32) {
    %c0_i32 = arith.constant 0 : i32
    %c0_i32_0 = arith.constant 0 : i32
    %c0_i32_1 = arith.constant 0 : i32
    return %c0_i32, %c0_i32_0 : i32, i32
  }
  func.func @transform_3(%arg0: i32) -> (i32, i32) {
    %c0_i32 = arith.constant 0 : i32
    %c0_i32_0 = arith.constant 0 : i32
    %c0_i32_1 = arith.constant 0 : i32
    return %c0_i32, %c0_i32_0 : i32, i32
  }
  func.func @transform_4(%arg0: i32) -> (i32, i32) {
    %c0_i32 = arith.constant 0 : i32
    %c0_i32_0 = arith.constant 0 : i32
    %c0_i32_1 = arith.constant 0 : i32
    return %c0_i32, %c0_i32_0 : i32, i32
  }
  func.func @transform_5(%arg0: i32) -> (i32, i32) {
    %c0_i32 = arith.constant 0 : i32
    %c0_i32_0 = arith.constant 0 : i32
    %c0_i32_1 = arith.constant 0 : i32
    return %c0_i32, %c0_i32_0 : i32, i32
  }
  func.func @transform_6(%arg0: i32) -> (i32, i32) {
    %c0_i32 = arith.constant 0 : i32
    %c0_i32_0 = arith.constant 0 : i32
    %c0_i32_1 = arith.constant 0 : i32
    return %c0_i32, %c0_i32_0 : i32, i32
  }
  func.func @transform_7(%arg0: i32) -> (i32, i32) {
    %c0_i32 = arith.constant 0 : i32
    %c0_i32_0 = arith.constant 0 : i32
    %c0_i32_1 = arith.constant 0 : i32
    return %c0_i32, %c0_i32_0 : i32, i32
  }
  func.func @transform_8(%arg0: i32) -> (i32, i32) {
    %c0_i32 = arith.constant 0 : i32
    %c0_i32_0 = arith.constant 0 : i32
    %c0_i32_1 = arith.constant 0 : i32
    return %c0_i32, %c0_i32_0 : i32, i32
  }
  func.func @transform_9(%arg0: i32) -> (i32, i32) {
    %c0_i32 = arith.constant 0 : i32
    %c0_i32_0 = arith.constant 0 : i32
    %c0_i32_1 = arith.constant 0 : i32
    return %c0_i32, %c0_i32_0 : i32, i32
  }
  func.func @transform_10(%arg0: i32) -> (i32, i32) {
    %c0_i32 = arith.constant 0 : i32
    %c0_i32_0 = arith.constant 0 : i32
    %c0_i32_1 = arith.constant 0 : i32
    return %c0_i32, %c0_i32_0 : i32, i32
  }
  func.func @transform_11(%arg0: i32) -> (i32, i32) {
    %c0_i32 = arith.constant 0 : i32
    %c0_i32_0 = arith.constant 0 : i32
    return %arg0, %c0_i32 : i32, i32
  }
}

</mosaic_0001>

<bundles_post_ra>
// kernel: network_anomaly_classifier.1
= control target key start
LH: loop header
LB: loop body
LE: loop exit
PB: predicated region body
PF: predicated region fallthrough
CT: control target
= control target key end

     0   :  { %16 = vsyncpa [#allocation3], 0  ;;  %s991_s0 = inlined_call_operand.vmem [shape: f32[16,6], index: 0, kind: input, shape index: {}]   ;;  %s992_s1 = inlined_call_operand.vmem [shape: f32[6,128], index: 1, kind: input, shape index: {}]   ;;  %s993_s2 = inlined_call_operand.vmem [shape: f32[1,128], index: 2, kind: input, shape index: {}]   ;;  %s994_s3 = inlined_call_operand.hbm [shape: bf16[128,256], index: 3, kind: input, shape index: {}]   ;;  %s995_s4 = inlined_call_operand.vmem [shape: f32[1,256], index: 4, kind: input, shape index: {}]   ;;  %s996_s5 = inlined_call_operand.hbm [shape: bf16[256,128], index: 5, kind: input, shape index: {}]   ;;  %s997_s6 = inlined_call_operand.vmem [shape: f32[1,128], index: 6, kind: input, shape index: {}]   ;;  %s998_s7 = inlined_call_operand.vmem [shape: bf16[128,64], index: 7, kind: input, shape index: {}]   ;;  %s999_s8 = inlined_call_operand.vmem [shape: f32[1,64], index: 8, kind: input, shape index: {}]   ;;  %s1000_s9 = inlined_call_operand.vmem [shape: bf16[64,128], index: 9, kind: input, shape index: {}]   ;;  %s1001_s10 = inlined_call_operand.vmem [shape: f32[1,128], index: 10, kind: input, shape index: {}]   ;;  %s1002_s11 = inlined_call_operand.vmem [shape: bf16[16,128], index: 11, kind: output, shape index: {}]  }
   0x1   :  { %s28_s19 = sshll.u32 %s994_s3, 4  ;;  %s29_s19 = int_to_ptr.hbm [resolvable:$true] %s28_s19 }
   0x2   :  { %17 = vsyncpa [#allocation5], 0  ;;  %s854_s20 = smov [#allocation2]   ;;  %s43_s24 = sshll.u32 %s996_s5, 4  ;;  %s44_s24 = int_to_ptr.hbm [resolvable:$true] %s43_s24 }
   0x3   :  { %s30_s21 = sshll.u32 %s854_s20, 4  ;;  %s855_s25 = smov 128   ;;  %s31_s21 = int_to_ptr.vmem [resolvable:$true] %s30_s21 }
   0x4   :  { %s856_s26 = smov 8   ;;  %s857_s27 = smov [#allocation4]  }
   0x5   :  { %36 = dma.hbm_to_vmem [thread:$0]  %s29_s19, 2048, %s31_s21, [#allocation3], %s855_s25, %s855_s25, %s856_s26  }
   0x6   :  { %s45_s28 = sshll.u32 %s857_s27, 4  ;;  %s858_s29 = smov 64   ;;  %s46_s28 = int_to_ptr.vmem [resolvable:$true] %s45_s28 }
   0x7   :  { %s859_s30 = smov 4  }
   0x8   :  { %51 = dma.hbm_to_vmem [thread:$0]  %s44_s24, 2048, %s46_s28, [#allocation5], %s858_s29, %s858_s29, %s859_s30  }
   0x9   :  { %850 = dma.done.wait [#allocation3], 2048  }
   0xa   :  { %851 = vsyncadd [#allocation3], 4294965248 }
   0xb   :  { %852 = dma.done.wait [#allocation5], 2048  }
   0xc   :  { %853 = vsyncadd [#allocation5], 4294965248  ;;  %vm85_vm0 = vcmask 1045504   ;;  %vm78_vm1 = vcmask 48128   ;;  %v73_v0 = vld [vmem:[%s992_s1] sm:$0x3f] }
   0xd   :  { %v71_v1 = vld [vmem:[%s991_s0] sm:$0xff]  ;;  %563 = vmatpush.msk.msra.mxu0 %vm85_vm0, %v73_v0  ;;  %v624_v2 = vld [vmem:[#allocation2 + $0x70] sm:$0xf]  ;;  %v758_v3 = vld [vmem:[#allocation2 + $0x74] sm:$0xf0]  ;;  %vm535_vm2 = vcmask 523264  }
   0xe   :  { %v757_v4 = vld [vmem:[#allocation2 + $0x74] sm:$0xf]  ;;  %564 = vmatmul.msk.f32.vlgmr.msra.gmra.mxu0 %vm78_vm1, %v71_v1  ;;  %v625_v5 = vor.u32 %v758_v3, %v624_v2  ;;  %v626_v6 = vld [vmem:[#allocation2 + $0x78] sm:$0xf0]  ;;  %v616_v7 = vld [vmem:[#allocation2 + $0x60] sm:$0xf] }
   0xf   :  { %v756_v8 = vld [vmem:[#allocation2 + $0x64] sm:$0xf0]  ;;  %v629_v9 = vor.u32 %v757_v4, %v626_v6  ;;  %v755_v10 = vld [vmem:[#allocation2 + $0x64] sm:$0xf]  ;;  %v618_v11 = vld [vmem:[#allocation2 + $0x68] sm:$0xf0] }
  0x10   :  { %217 = vmatpush.bf16.msra.mxu1 %v625_v5  ;;  %v617_v12 = vor.u32 %v756_v8, %v616_v7  ;;  %v72_v13 = vld [vmem:[%s991_s0 + $0x8] sm:$0xff]  ;;  %v621_v14 = vor.u32 %v755_v10, %v618_v11  ;;  %v608_v15 = vld [vmem:[#allocation2 + $0x50] sm:$0xf]  ;;  %v754_v16 = vld [vmem:[#allocation2 + $0x54] sm:$0xf0] }
  0x11   :  { %231 = vmatpush.bf16.msra.mxu2 %v629_v9  ;;  %v753_v17 = vld [vmem:[#allocation2 + $0x54] sm:$0xf]  ;;  %v610_v18 = vld [vmem:[#allocation2 + $0x58] sm:$0xf0]  ;;  %v609_v19 = vor.u32 %v754_v16, %v608_v15  ;;  %v600_v21 = vld [vmem:[#allocation2 + $0x40] sm:$0xf] }
  0x12   :  { %v613_v20 = vor.u32 %v753_v17, %v610_v18  ;;  %v752_v22 = vld [vmem:[#allocation2 + $0x44] sm:$0xf0]  ;;  %v751_v23 = vld [vmem:[#allocation2 + $0x44] sm:$0xf]  ;;  %v602_v24 = vld [vmem:[#allocation2 + $0x48] sm:$0xf0] }
  0x13   :  { %v601_v25 = vor.u32 %v752_v22, %v600_v21  ;;  %v605_v26 = vor.u32 %v751_v23, %v602_v24  ;;  %v592_v27 = vld [vmem:[#allocation2 + $0x30] sm:$0xf]  ;;  %v750_v28 = vld [vmem:[#allocation2 + $0x34] sm:$0xf0]  ;;  %v749_v29 = vld [vmem:[#allocation2 + $0x34] sm:$0xf] }
  0x14   :  { %218 = vmatpush.bf16.msra.mxu1 %v617_v12  ;;  %v593_v30 = vor.u32 %v750_v28, %v592_v27  ;;  %v594_v31 = vld [vmem:[#allocation2 + $0x38] sm:$0xf0]  ;;  %v584_v33 = vld [vmem:[#allocation2 + $0x20] sm:$0xf]  ;;  %v748_v34 = vld [vmem:[#allocation2 + $0x24] sm:$0xf0] }
  0x15   :  { %232 = vmatpush.bf16.msra.mxu2 %v621_v14  ;;  %v597_v32 = vor.u32 %v749_v29, %v594_v31  ;;  %v747_v35 = vld [vmem:[#allocation2 + $0x24] sm:$0xf]  ;;  %v585_v36 = vor.u32 %v748_v34, %v584_v33  ;;  %v586_v37 = vld [vmem:[#allocation2 + $0x28] sm:$0xf0]  ;;  %v576_v39 = vld [vmem:[#allocation2 + $0x10] sm:$0xf] }
  0x16   :  { %565 = vmatmul.msk.f32.gmra.mxu0 %vm78_vm1, %v72_v13  ;;  %v589_v38 = vor.u32 %v747_v35, %v586_v37  ;;  %v746_v40 = vld [vmem:[#allocation2 + $0x14] sm:$0xf0]  ;;  %v745_v41 = vld [vmem:[#allocation2 + $0x14] sm:$0xf]  ;;  %v578_v43 = vld [vmem:[#allocation2 + $0x18] sm:$0xf0] }
  0x17   :  { %v577_v42 = vor.u32 %v746_v40, %v576_v39  ;;  %v581_v44 = vor.u32 %v745_v41, %v578_v43  ;;  %v568_v45 = vld [vmem:[#allocation2] sm:$0xf]  ;;  %v744_v46 = vld [vmem:[#allocation2 + $0x4] sm:$0xf0]  ;;  %v743_v47 = vld [vmem:[#allocation2 + $0x4] sm:$0xf] }
  0x18   :  { %219 = vmatpush.bf16.msra.mxu1 %v609_v19  ;;  %v569_v48 = vor.u32 %v744_v46, %v568_v45  ;;  %v570_v49 = vld [vmem:[#allocation2 + $0x8] sm:$0xf0]  ;;  %v766_v51 = vld [vmem:[#allocation4 + $0x38] sm:$0xff]  ;;  %v765_v53 = vld [vmem:[#allocation4 + $0x30] sm:$0xff] }
  0x19   :  { %233 = vmatpush.bf16.msra.mxu2 %v613_v20  ;;  %v573_v50 = vor.u32 %v743_v47, %v570_v49  ;;  %v774_v52 = vld [vmem:[#allocation4 + $0x78] sm:$0xff]  ;;  %383 = vmatpush.bf16.msra.mxu3 %v766_v51  ;;  %v773_v54 = vld [vmem:[#allocation4 + $0x70] sm:$0xff]  ;;  %v764_v55 = vld [vmem:[#allocation4 + $0x28] sm:$0xff] }
  0x1a   :  { %397 = vmatpush.bf16.msrb.mxu0 %v774_v52  ;;  %v772_v56 = vld [vmem:[#allocation4 + $0x68] sm:$0xff]  ;;  %v763_v57 = vld [vmem:[#allocation4 + $0x20] sm:$0xff]  ;;  %v762_v2 = vld [vmem:[#allocation4 + $0x18] sm:$0xff] }
  0x1b   :  { %v798_v59 = vld [vmem:[%s993_s2] ss:$0 sm:$0xff]  ;;  %v761_v4 = vld [vmem:[#allocation4 + $0x10] sm:$0xff]  ;;  %v770_v5 = vld [vmem:[#allocation4 + $0x58] sm:$0xff] }
  0x1c   :  { %220 = vmatpush.bf16.msra.mxu1 %v601_v25  ;;  %v771_v3 = vld [vmem:[#allocation4 + $0x60] sm:$0xff]  ;;  %v760_v6 = vld [vmem:[#allocation4 + $0x8] sm:$0xff]  ;;  %v769_v7 = vld [vmem:[#allocation4 + $0x50] sm:$0xff] }
  0x1d   :  { %234 = vmatpush.bf16.msra.mxu2 %v605_v26  ;;  %384 = vmatpush.bf16.msra.mxu3 %v765_v53  ;;  %v759_v8 = vld [vmem:[#allocation4] sm:$0xff]  ;;  %v768_v9 = vld [vmem:[#allocation4 + $0x48] sm:$0xff]  ;;  %v782_v11 = vld [vmem:[%s998_s7 + $0x38] sm:$0xff] }
  0x1e   :  { %398 = vmatpush.bf16.msrb.mxu0 %v773_v54  ;;  %v767_v10 = vld [vmem:[#allocation4 + $0x40] sm:$0xff]  ;;  %v781_v12 = vld [vmem:[%s998_s7 + $0x30] sm:$0xff]  ;;  %v780_v13 = vld [vmem:[%s998_s7 + $0x28] sm:$0xff] }
  0x1f   :  { %v779_v14 = vld [vmem:[%s998_s7 + $0x20] sm:$0xff]  ;;  %v777_v33 = vld [vmem:[%s998_s7 + $0x10] sm:$0xff]  ;;  %v776_v34 = vld [vmem:[%s998_s7 + $0x8] sm:$0xff] }
  0x20   :  { %221 = vmatpush.bf16.msra.mxu1 %v593_v30  ;;  %v131_v15 = vld [vmem:[%s995_s4] sm:$0x3]  ;;  %v785_v49 = vld [vmem:[%s1000_s9 + $0x10] sm:$0xff] }
  0x21   :  { %235 = vmatpush.bf16.msra.mxu2 %v597_v32  ;;  %385 = vmatpush.bf16.msra.mxu3 %v764_v55  ;;  %v133_v17 = vperm.slane %v131_v15, 0  ;;  %v134_v21 = vperm.slane %v131_v15, 1  ;;  %v778_v32 = vld [vmem:[%s998_s7 + $0x18] sm:$0xff]  ;;  %v775_v35 = vld [vmem:[%s998_s7] sm:$0xff] }
  0x22   :  { %399 = vmatpush.bf16.msrb.mxu0 %v772_v56  ;;  %v799_v39 = vld [vmem:[%s997_s6] ss:$0 sm:$0xff] }
  0x23   :  { %v783_v51 = vld [vmem:[%s1000_s9] sm:$0xff] }
  0x24   :  { %222 = vmatpush.bf16.msra.mxu1 %v585_v36  ;;  %v786_v36 = vld [vmem:[%s1000_s9 + $0x18] sm:$0xff]  ;;  %v800_v53 = vld [vmem:[%s999_s8] ss:$0 sm:$0xff] }
  0x25   :  { %236 = vmatpush.bf16.msra.mxu2 %v589_v38  ;;  %386 = vmatpush.bf16.msra.mxu3 %v763_v57 }
  0x26   :  { %400 = vmatpush.bf16.msrb.mxu0 %v771_v3 }
  0x28   :  { %223 = vmatpush.bf16.msra.mxu1 %v577_v42 }
  0x29   :  { %237 = vmatpush.bf16.msra.mxu2 %v581_v44  ;;  %387 = vmatpush.bf16.msra.mxu3 %v762_v2 }
  0x2a   :  { %401 = vmatpush.bf16.msrb.mxu0 %v770_v5 }
  0x2c   :  { %224 = vmatpush.bf16.msra.mxu1 %v569_v48 }
  0x2d   :  { %238 = vmatpush.bf16.msra.mxu2 %v573_v50  ;;  %388 = vmatpush.bf16.msra.mxu3 %v761_v4  ;;  %v784_v50 = vld [vmem:[%s1000_s9 + $0x8] sm:$0xff] }
  0x2e   :  { %402 = vmatpush.bf16.msrb.mxu0 %v769_v7 }
  0x30   :  { %482 = vmatpush.bf16.msrb.mxu1 %v782_v11 }
  0x31   :  { %389 = vmatpush.bf16.msra.mxu3 %v760_v6  ;;  %543 = vmatpush.bf16.msrb.mxu2 %v786_v36 }
  0x32   :  { %403 = vmatpush.bf16.msrb.mxu0 %v768_v9 }
  0x34   :  { %483 = vmatpush.bf16.msrb.mxu1 %v781_v12 }
  0x35   :  { %390 = vmatpush.bf16.msra.mxu3 %v759_v8  ;;  %544 = vmatpush.bf16.msrb.mxu2 %v785_v49 }
  0x36   :  { %404 = vmatpush.bf16.msrb.mxu0 %v767_v10 }
  0x38   :  { %484 = vmatpush.bf16.msrb.mxu1 %v780_v13 }
  0x39   :  { %545 = vmatpush.bf16.msrb.mxu2 %v784_v50 }
  0x3c   :  { %485 = vmatpush.bf16.msrb.mxu1 %v779_v14 }
  0x3d   :  { %546 = vmatpush.bf16.msrb.mxu2 %v783_v51 }
  0x40   :  { %486 = vmatpush.bf16.msrb.mxu1 %v778_v32 }
  0x44   :  { %487 = vmatpush.bf16.msrb.mxu1 %v777_v33 }
  0x48   :  { %488 = vmatpush.bf16.msrb.mxu1 %v776_v34 }
  0x4c   :  { %489 = vmatpush.bf16.msrb.mxu1 %v775_v35 }
  0x8b   :  { %v106_v58 = vpop.f32.mrf.mxu0 }
  0x8c   :  { %v107_v60 = vadd.f32 %v798_v59, %v106_v58 }
  0x8e   :  { %v112_v63 = vmax.f32 %v107_v60, 0.0 }
  0x93   :  { %v109_v61 = vpop.f32.mrf.mxu0 }
  0x94   :  { %v110_v62 = vadd.f32 %v798_v59, %v109_v61  ;;  %v801_v61 = vld [vmem:[%s1001_s10] ss:$0 sm:$0xff] }
  0x96   :  { %v113_v0 = vmax.f32 %v110_v62, 0.0 }
  0x98   :  { %v114_v1 = vpack.c.bf16 %v113_v0, %v112_v63 }
  0x9a   :  { %225 = vmatmul.bf16.vlgmr.msra.gmra.mxu1 %v114_v1  ;;  %239 = vmatmul.bf16.vlgmr.msra.gmra.mxu2 %v114_v1 }
 0x117   :  { %v226_v16 = vpop.f32.mrf.mxu1 }
 0x118   :  { %v227_v19 = vadd.f32 %v226_v16, %v133_v17 }
 0x11a   :  { %v245_v23 = vmax.f32 %v227_v19, 0.0 }
 0x11d   :  { %v240_v18 = vpop.f32.mrf.mxu2 }
 0x11e   :  { %v241_v25 = vadd.f32 %v240_v18, %v134_v21 }
 0x11f   :  { %v228_v20 = vpop.f32.mrf.mxu1 }
 0x120   :  { %v229_v22 = vadd.f32 %v228_v20, %v133_v17  ;;  %v246_v29 = vmax.f32 %v241_v25, 0.0 }
 0x122   :  { %v247_v24 = vmax.f32 %v229_v22, 0.0 }
 0x124   :  { %v249_v26 = vpack.c.bf16 %v247_v24, %v245_v23 }
 0x125   :  { %v242_v27 = vpop.f32.mrf.mxu2 }
 0x126   :  { %v243_v28 = vadd.f32 %v242_v27, %v134_v21  ;;  %391 = vmatmul.bf16.vlgmr.msra.gmra.mxu3 %v249_v26 }
 0x128   :  { %v248_v30 = vmax.f32 %v243_v28, 0.0 }
 0x12a   :  { %v250_v31 = vpack.c.bf16 %v248_v30, %v246_v29 }
 0x12c   :  { %405 = vmatmul.bf16.vlgmr.msrb.gmra.mxu0 %v250_v31 }
 0x1a9   :  { %v392_v37 = vpop.f32.mrf.mxu3  ;;  %v406_v38 = vpop.f32.mrf.mxu0 }
 0x1aa   :  { %v393_v40 = vadd.f32 %v799_v39, %v392_v37 }
 0x1ac   :  { %v407_v42 = vadd.f32 %v406_v38, %v393_v40 }
 0x1ae   :  { %v411_v46 = vmax.f32 %v407_v42, 0.0 }
 0x1b1   :  { %v394_v41 = vpop.f32.mrf.mxu3  ;;  %v408_v44 = vpop.f32.mrf.mxu0 }
 0x1b2   :  { %v395_v43 = vadd.f32 %v799_v39, %v394_v41 }
 0x1b4   :  { %v409_v45 = vadd.f32 %v408_v44, %v395_v43 }
 0x1b6   :  { %v412_v47 = vmax.f32 %v409_v45, 0.0 }
 0x1b8   :  { %v413_v48 = vpack.c.bf16 %v412_v47, %v411_v46 }
 0x1ba   :  { %490 = vmatmul.bf16.vlgmr.msrb.gmra.mxu1 %v413_v48 }
 0x237   :  { %v491_v52 = vpop.f32.mrf.mxu1 }
 0x238   :  { %v492_v54 = vadd.f32 %v800_v53, %v491_v52 }
 0x23a   :  { %v496_v57 = vmax.f32 %v492_v54, 0.0 }
 0x23f   :  { %v493_v55 = vpop.f32.mrf.mxu1 }
 0x240   :  { %v494_v56 = vadd.f32 %v800_v53, %v493_v55 }
 0x242   :  { %v497_v58 = vmax.f32 %v494_v56, 0.0 }
 0x244   :  { %v498_v59 = vpack.c.bf16 %v497_v58, %v496_v57 }
 0x246   :  { %742 = vmatmul.msk.bf16.vlgmr.msrb.gmra.mxu2 %vm535_vm2, %v498_v59 }
 0x2c9   :  { %v548_v60 = vpop.f32.mrf.mxu2 }
 0x2ca   :  { %v549_v63 = vadd.f32 %v801_v61, %v548_v60 }
 0x2d1   :  { %v550_v62 = vpop.f32.mrf.mxu2 }
 0x2d2   :  { %v551_v0 = vadd.f32 %v801_v61, %v550_v62 }
 0x2d4   :  { %v790_v1 = vpack.c.bf16 %v551_v0, %v549_v63 }
 0x2d6   :  { %791 = vst [vmem:[%s1002_s11] sm:$0xff] %v790_v1  }
 0x2d7   :  { %561 = vsyncpa [#allocation3], 1 }
 0x2d8   :  { %562 = vsyncpa [#allocation5], 1 }

</bundles_post_ra>
